<compile_context>
chip_gen: v5e
topology: v5e:2x2
jax: 0.10.0
libtpu: 0.0.40
codegen_flags: <defaults>
</compile_context>

<pallas_src>
import functools
import math

import jax
import jax.numpy as jnp
from jax.experimental import pallas as pl
from jax.experimental.pallas import tpu as pltpu


_TARGET_BLOCK_BYTES = 4 * 1024 * 1024   # ~4 MiB input blocks: >=85% of HBM
                                        # roofline on v5e/v6e, amortizes the
                                        # ~0.35us grid-step cost on v7x, and
                                        # 2x-buffered stays inside every chip's
                                        # scoped-VMEM budget.
_MAX_ROWS = 2048                        # cap on the sublane-dim tile


def _sublane(itemsize):
    return {4: 8, 2: 16, 1: 32}.get(itemsize, 8)


def _rdown(v, m):
    return (v // m) * m


def _rup(v, m):
    return ((v + m - 1) // m) * m


def _vmem_limit(nbytes):
    return int(min(max(nbytes + (8 << 20), 32 << 20), 96 << 20))


# ---------------------------------------------------------------------------
# |x|^p and p-th root, specialized at trace time (p is a static Python float).
# ---------------------------------------------------------------------------
def _int_pow(a, n):
    r = a
    for _ in range(n - 1):
        r = r * a
    return r


def _pow_p(x, exp):
    if exp == 2.0:
        return x * x                            # VPU multiply, no abs needed
    if exp == 1.0:
        return jnp.abs(x)
    a = jnp.abs(x)
    if exp.is_integer() and 2.0 < exp <= 8.0:
        return _int_pow(a, int(exp))            # repeated VPU multiplies
    if (2.0 * exp).is_integer() and 0.5 <= exp <= 8.5:
        n = int(exp)                            # exp = n + 0.5
        s = jnp.sqrt(a)                         # 1 EUP op instead of exp+log
        return s if n == 0 else _int_pow(a, n) * s
    return jnp.power(a, jnp.float32(exp))       # generic fractional p (2 EUP ops)


def _root_p(s, exp):
    if exp == 2.0:
        return jnp.sqrt(s)
    if exp == 1.0:
        return s
    if exp == 0.5:
        return s * s
    return jnp.power(s, jnp.float32(1.0 / exp))


# ---------------------------------------------------------------------------
# Kernel 1: reduce the trailing axis of a (M, K) view.
# grid = (M blocks [parallel], K blocks [arbitrary]); f32 scratch accumulator.
# ---------------------------------------------------------------------------
def _norm_last_kernel(x_ref, o_ref, acc_ref, *, exp, K):
    k = pl.program_id(1)
    TK = x_ref.shape[1]

    @pl.when(k == 0)
    def _():
        acc_ref[...] = jnp.zeros_like(acc_ref)

    x = x_ref[...].astype(jnp.float32)                 # native-dtype DMA, f32 math
    if K % TK != 0:                                    # ragged reduce axis: mask
        col = k * TK + jax.lax.broadcasted_iota(jnp.int32, x.shape, 1)
        x = jnp.where(col < K, x, 0.0)                 # (no jnp.pad HBM pass)
    p = _pow_p(x, exp)

    if acc_ref.shape[1] == 128:                        # lane-dense accumulation:
        part = p[:, 0:128]                             # vreg-aligned column folds,
        for c in range(1, TK // 128):                  # pure VALU adds
            part = part + p[:, c * 128:(c + 1) * 128]
        acc_ref[...] += part
    else:                                              # TK not a multiple of 128
        acc_ref[...] += jnp.sum(p, axis=-1, keepdims=True)

    @pl.when(k == pl.num_programs(1) - 1)
    def _():
        s = jnp.sum(acc_ref[...], axis=-1, keepdims=True)   # single XLU fold
        o_ref[...] = _root_p(s, exp).astype(o_ref.dtype)


def _reduce_last(x2, exp):
    M, K = x2.shape
    esz = x2.dtype.itemsize
    sub = _sublane(esz)
    target = _TARGET_BLOCK_BYTES // esz                # elements per input block

    TK = K if K <= 4096 else 4096                      # multiple of 128 when split
    rows = max(sub, min(_MAX_ROWS, target // max(TK, 1)))
    if M <= rows:
        TM = M if M < sub else _rdown(M, sub)
        if M >= 2 * sub:                               # v7x: keep >=2 parallel blocks
            TM = min(_rup((M + 1) // 2, sub), _rdown(M, sub))
    else:
        TM = min(_rdown(rows, sub), _rdown(M, sub))
    TM = max(TM, 1)

    acc_w = 128 if TK % 128 == 0 else 1
    grid = (pl.cdiv(M, TM), pl.cdiv(K, TK))
    need = 2 * TM * TK * esz + 2 * TM * 128 * esz + TM * 128 * 4
    return pl.pallas_call(
        functools.partial(_norm_last_kernel, exp=exp, K=K),
        out_shape=jax.ShapeDtypeStruct((M, 1), x2.dtype),
        grid=grid,
        in_specs=[pl.BlockSpec((TM, TK), lambda i, k: (i, k))],
        out_specs=pl.BlockSpec((TM, 1), lambda i, k: (i, 0)),
        scratch_shapes=[pltpu.VMEM((TM, acc_w), jnp.float32)],
        compiler_params=pltpu.CompilerParams(
            dimension_semantics=("parallel", "arbitrary"),
            vmem_limit_bytes=_vmem_limit(need)),
    )(x2)


# ---------------------------------------------------------------------------
# Kernel 2: reduce the middle axis of an (A, K, B) view (no HBM transpose).
# grid = (A blocks [parallel], K blocks [arbitrary]); acc is lane-dense (TA, B).
# ---------------------------------------------------------------------------
def _norm_mid_kernel(x_ref, o_ref, acc_ref, *, exp, K):
    k = pl.program_id(1)
    TK = x_ref.shape[1]

    @pl.when(k == 0)
    def _():
        acc_ref[...] = jnp.zeros_like(acc_ref)

    x = x_ref[...].astype(jnp.float32)                 # (TA, TK, B)
    if K % TK != 0:
        mid = k * TK + jax.lax.broadcasted_iota(jnp.int32, x.shape, 1)
        x = jnp.where(mid < K, x, 0.0)
    acc_ref[...] += jnp.sum(_pow_p(x, exp), axis=1)    # sublane-axis reduce

    @pl.when(k == pl.num_programs(1) - 1)
    def _():
        o_ref[...] = _root_p(acc_ref[...], exp).astype(o_ref.dtype)


def _reduce_mid(x3, exp):
    A, K, B = x3.shape
    esz = x3.dtype.itemsize
    sub = _sublane(esz)
    target = _TARGET_BLOCK_BYTES // esz

    ta_min = A if A < sub else sub
    if K * B * ta_min <= target or K <= 8:
        TK = K                                         # full reduce axis per block
    else:
        TK = max(8, min(_rdown(K, 8), _rdown(target // (ta_min * B), 8)))
    TA = target // max(TK * B, 1)
    if TA >= A:
        TA = A
        if A >= 2 * sub:                               # v7x: >=2 parallel A blocks
            TA = min(_rup((A + 1) // 2, sub), _rdown(A, sub))
    else:
        TA = max(ta_min, min(_MAX_ROWS, _rdown(TA, sub), _rdown(A, sub)))
    TA = max(TA, 1)

    grid = (pl.cdiv(A, TA), pl.cdiv(K, TK))
    need = 2 * TA * TK * B * esz + 2 * TA * B * esz + TA * B * 4
    return pl.pallas_call(
        functools.partial(_norm_mid_kernel, exp=exp, K=K),
        out_shape=jax.ShapeDtypeStruct((A, B), x3.dtype),
        grid=grid,
        in_specs=[pl.BlockSpec((TA, TK, B), lambda a, k: (a, k, 0))],
        out_specs=pl.BlockSpec((TA, B), lambda a, k: (a, 0)),
        scratch_shapes=[pltpu.VMEM((TA, B), jnp.float32)],
        compiler_params=pltpu.CompilerParams(
            dimension_semantics=("parallel", "arbitrary"),
            vmem_limit_bytes=_vmem_limit(need)),
    )(x3)


# ---------------------------------------------------------------------------
# Kernel 3: full reduction of an (R, C) view.  Each parallel column slice
# accumulates a lane-dense (TR, 128) partial directly in its output block;
# the wrapper does the final tiny sum + ^(1/p).
# ---------------------------------------------------------------------------
def _norm_all_kernel(x_ref, o_ref, *, exp, R):
    k = pl.program_id(1)
    TR, CP = x_ref.shape

    @pl.when(k == 0)
    def _():
        o_ref[...] = jnp.zeros_like(o_ref)

    x = x_ref[...].astype(jnp.float32)                 # (TR, CP)
    if R % TR != 0:                                    # ragged row axis: mask
        row = k * TR + jax.lax.broadcasted_iota(jnp.int32, x.shape, 0)
        x = jnp.where(row < R, x, 0.0)
    p = _pow_p(x, exp)
    part = p[:, 0:128]
    for c in range(1, CP // 128):                      # vreg-aligned VALU folds
        part = part + p[:, c * 128:(c + 1) * 128]
    o_ref[...] += part


def _reduce_all(x, exp):
    """Full reduction to a scalar (dim=None or dim covering every axis)."""
    N = math.prod(x.shape) if x.shape else 1
    esz = x.dtype.itemsize
    sub = _sublane(esz)

    C = 0
    for cand in (4096, 2048, 1024, 512, 256, 128):
        if N % cand == 0 and N // cand >= 8:
            C = cand
            break
    if C == 0:
        # Awkward N (not a multiple of 128 / tiny): (1, N) fallback through the
        # 2-D kernel.  Correct but sublane-sparse; rare in practice.
        return _reduce_last(x.reshape(1, N), exp).reshape(())

    R = N // C
    P = 2 if C >= 256 else 1                           # v7x: 2 parallel col slices
    CP = C // P
    target = _TARGET_BLOCK_BYTES // esz
    rq = sub if (R % sub == 0 or R >= 2 * sub) else 8  # row quantum, always <= R
    TR = max(8, min(_MAX_ROWS, _rdown(target // CP, rq) or rq, _rdown(R, rq)))

    grid = (P, pl.cdiv(R, TR))
    need = 2 * TR * CP * esz + 2 * TR * 128 * 4
    partials = pl.pallas_call(
        functools.partial(_norm_all_kernel, exp=exp, R=R),
        out_shape=jax.ShapeDtypeStruct((P * TR, 128), jnp.float32),
        grid=grid,
        in_specs=[pl.BlockSpec((TR, CP), lambda p_, r: (r, p_))],
        out_specs=pl.BlockSpec((TR, 128), lambda p_, r: (p_, 0)),
        compiler_params=pltpu.CompilerParams(
            dimension_semantics=("parallel", "arbitrary"),
            vmem_limit_bytes=_vmem_limit(need)),
    )(x.reshape(R, C))
    return _root_p(jnp.sum(partials), exp).astype(x.dtype)


# ---------------------------------------------------------------------------
# Wrapper: matches the decomposed torch module's forward semantics.
# ---------------------------------------------------------------------------
def linalg_vector_norm(x, exp=2.0, dim=None, keepdim=False):
    exp = float(exp)
    if not (exp > 0.0 and math.isfinite(exp)):
        raise NotImplementedError(
            "Pallas LinalgVectorNorm supports 0 < ord < inf; ord in {0, inf, "
            "-inf} would need count-nonzero / max / min reductions.")

    if x.ndim == 0:
        x = x.reshape(1)
    orig_shape = x.shape
    ndim = x.ndim

    if dim is None:
        red = tuple(range(ndim))
    else:
        dims = dim if isinstance(dim, (tuple, list)) else (dim,)
        red = tuple(sorted(set(d % ndim for d in dims)))
    keep = tuple(d for d in range(ndim) if d not in red)

    if dim is None:
        # Module flattens first and reduces dim 0 -> keepdim keeps only that dim.
        out_shape = (1,) if keepdim else ()
    elif keepdim:
        out_shape = tuple(1 if d in red else orig_shape[d] for d in range(ndim))
    else:
        out_shape = tuple(orig_shape[d] for d in keep)

    M = math.prod(orig_shape[d] for d in keep) if keep else 1
    K = math.prod(orig_shape[d] for d in red) if red else 1
    esz = x.dtype.itemsize

    if not keep:
        res = _reduce_all(x, exp)
    elif red == tuple(range(ndim - len(red), ndim)):
        # Reduced dims already trailing: plain (M, K) view, no data movement.
        res = _reduce_last(x.reshape(M, K), exp)
    elif (red == tuple(range(red[0], red[0] + len(red)))
          and math.prod(orig_shape[red[-1] + 1:]) * 64 * esz <= _TARGET_BLOCK_BYTES):
        # Contiguous middle reduce dims: (A, K, B) view, no HBM transpose pass.
        A = math.prod(orig_shape[:red[0]]) if red[0] > 0 else 1
        B = math.prod(orig_shape[red[-1] + 1:])
        res = _reduce_mid(x.reshape(A, K, B), exp)
    else:
        # Scattered reduce dims: one transpose pass + trailing-axis kernel.
        xt = jnp.transpose(x, keep + red)
        res = _reduce_last(xt.reshape(M, K), exp)

    return res.reshape(out_shape)


# ---------------------------------------------------------------------------
# Reference (module semantics) + demo.
# ---------------------------------------------------------------------------
def _reference(x, exp, dim, keepdim):
    xf = x.astype(jnp.float32)
    if dim is None:
        xf = xf.reshape(-1)
        dim = 0
    s = jnp.sum(jnp.power(jnp.abs(xf), exp), axis=dim, keepdims=keepdim)
    return jnp.power(s, 1.0 / exp)


if __name__ == "__main__":
    key = jax.random.PRNGKey(0)
    x = jax.random.normal(key, (2, 4, 16, 16), dtype=jnp.float32)

    def _check(y, y_ref, shape, rtol=1e-4, atol=1e-4):
        y = jax.block_until_ready(y)
        assert y.shape == shape, (y.shape, shape)
        assert jnp.allclose(jnp.asarray(y, jnp.float32),
                            jnp.asarray(y_ref, jnp.float32),
                            rtol=rtol, atol=atol), (y, y_ref)

    # 1) L2 over trailing spatial dims, keepdim (2-D trailing-reduce kernel, p=2).
    y = linalg_vector_norm(x, exp=2.0, dim=(2, 3), keepdim=True)
    _check(y, _reference(x, 2.0, (2, 3), True), (2, 4, 1, 1))

    # 2) dim=None full reduce, integer p=3 (dense (R, C) full-reduce kernel,
    #    2-wide parallel column split, wrapper-side final sum + cube root).
    y = linalg_vector_norm(x, exp=3.0, dim=None, keepdim=False)
    _check(y, _reference(x, 3.0, None, False), ())

    # 2b) dim=None, keepdim=True -> shape (1,) per the module's flatten semantics.
    y = linalg_vector_norm(x, exp=2.0, dim=None, keepdim=True)
    _check(y, _reference(x, 2.0, None, True), (1,))

    # 3) non-trailing contiguous reduce dim + half-integer p=2.5
    #    (3-D middle-reduce kernel, no HBM transpose; x^2*sqrt(x), no pow fallback).
    y = linalg_vector_norm(x, exp=2.5, dim=(1,), keepdim=False)
    _check(y, _reference(x, 2.5, (1,), False), (2, 16, 16))

    # 4) scattered reduce dims -> single transpose pass + 2-D kernel.
    y = linalg_vector_norm(x, exp=2.0, dim=(0, 2), keepdim=False)
    _check(y, _reference(x, 2.0, (0, 2), False), (4, 16))

    # 5) long ragged reduce axis (K=5000 > TK=4096): in-kernel iota mask,
    #    lane-dense accumulator, 2 parallel M blocks.
    x5 = jax.random.normal(jax.random.PRNGKey(1), (16, 5000), dtype=jnp.float32)
    y = linalg_vector_norm(x5, exp=2.0, dim=(1,), keepdim=False)
    _check(y, _reference(x5, 2.0, (1,), False), (16,))

    # 6) tiny M with non-128-multiple K (full-extent block, (TM,1) accumulator).
    x6 = jax.random.normal(jax.random.PRNGKey(2), (3, 1300), dtype=jnp.float32)
    y = linalg_vector_norm(x6, exp=2.0, dim=(1,), keepdim=True)
    _check(y, _reference(x6, 2.0, (1,), True), (3, 1))

    # 7) bf16 input: native-dtype DMA, f32 accumulation, bf16 result.
    xb = x.astype(jnp.bfloat16)
    y = linalg_vector_norm(xb, exp=2.0, dim=(2, 3), keepdim=True)
    assert y.dtype == jnp.bfloat16
    _check(y, _reference(xb, 2.0, (2, 3), True), (2, 4, 1, 1), rtol=2e-2, atol=2e-2)

    print("KERNEL_OK")
</pallas_src>

<mosaic_0001>
module attributes {stable_mosaic.version = 11 : i64} {
  func.func @_norm_last_kernel(%arg0: i32, %arg1: i32, %arg2: memref<8x256xf32, #tpu.memory_space<vmem>>, %arg3: memref<8x1xf32, #tpu.memory_space<vmem>>, %arg4: memref<8x128xf32, #tpu.memory_space<vmem>>) attributes {dimension_semantics = [#tpu.dimension_semantics<parallel>, #tpu.dimension_semantics<arbitrary>], iteration_bounds = array<i64: 1, 1>, scalar_prefetch = 0 : i64, scratch_operands = 1 : i64, tpu.core_type = #tpu.core_type<tc>, window_params = [{transform_indices = @transform_0, window_bounds = array<i64: 8, 256>}, {transform_indices = @transform_1, window_bounds = array<i64: 8, 1>}]} {
    %c0_i32 = arith.constant 0 : i32
    %0 = arith.cmpi eq, %arg1, %c0_i32 : i32
    %1 = arith.extui %0 : i1 to i32
    %c0_i32_0 = arith.constant 0 : i32
    %2 = arith.cmpi ne, %1, %c0_i32_0 : i32
    scf.if %2 {
      %cst = arith.constant 0.000000e+00 : f32
      %14 = vector.broadcast %cst : f32 to vector<8x128xf32>
      %c0_8 = arith.constant 0 : index
      %c0_9 = arith.constant 0 : index
      %15 = vector.load %arg4[%c0_8, %c0_9] : memref<8x128xf32, #tpu.memory_space<vmem>>, vector<8x128xf32>
      tpu.vector_store %arg4[%c0_8, %c0_9], %14 {strides = array<i32>} : memref<8x128xf32, #tpu.memory_space<vmem>>, vector<8x128xf32>,
    } else {
    }
    %c0 = arith.constant 0 : index
    %c0_1 = arith.constant 0 : index
    %3 = vector.load %arg2[%c0, %c0_1] : memref<8x256xf32, #tpu.memory_space<vmem>>, vector<8x256xf32>
    %4 = arith.mulf %3, %3 : vector<8x256xf32>
    %5 = vector.extract_strided_slice %4 {offsets = [0, 0], sizes = [8, 128], strides = [1, 1]} : vector<8x256xf32> to vector<8x128xf32>
    %6 = vector.extract_strided_slice %4 {offsets = [0, 128], sizes = [8, 128], strides = [1, 1]} : vector<8x256xf32> to vector<8x128xf32>
    %7 = arith.addf %5, %6 : vector<8x128xf32>
    %c0_2 = arith.constant 0 : index
    %c0_3 = arith.constant 0 : index
    %8 = vector.load %arg4[%c0_2, %c0_3] : memref<8x128xf32, #tpu.memory_space<vmem>>, vector<8x128xf32>
    %9 = arith.addf %8, %7 : vector<8x128xf32>
    %c0_4 = arith.constant 0 : index
    %c0_5 = arith.constant 0 : index
    %10 = vector.load %arg4[%c0_4, %c0_5] : memref<8x128xf32, #tpu.memory_space<vmem>>, vector<8x128xf32>
    tpu.vector_store %arg4[%c0_4, %c0_5], %9 {strides = array<i32>} : memref<8x128xf32, #tpu.memory_space<vmem>>, vector<8x128xf32>,
    %c0_i32_6 = arith.constant 0 : i32
    %11 = arith.cmpi eq, %arg1, %c0_i32_6 : i32
    %12 = arith.extui %11 : i1 to i32
    %c0_i32_7 = arith.constant 0 : i32
    %13 = arith.cmpi ne, %12, %c0_i32_7 : i32
    scf.if %13 {
      %c0_8 = arith.constant 0 : index
      %c0_9 = arith.constant 0 : index
      %14 = vector.load %arg4[%c0_8, %c0_9] : memref<8x128xf32, #tpu.memory_space<vmem>>, vector<8x128xf32>
      %cst = arith.constant dense<0.000000e+00> : vector<8xf32>
      %15 = vector.multi_reduction <add>, %14, %cst [1] : vector<8x128xf32> to vector<8xf32>
      %16 = vector.shape_cast %15 : vector<8xf32> to vector<8x1xf32>
      %17 = math.sqrt %16 : vector<8x1xf32>
      %c0_10 = arith.constant 0 : index
      %c0_11 = arith.constant 0 : index
      %18 = vector.load %arg3[%c0_10, %c0_11] : memref<8x1xf32, #tpu.memory_space<vmem>>, vector<8x1xf32>
      tpu.vector_store %arg3[%c0_10, %c0_11], %17 {strides = array<i32>} : memref<8x1xf32, #tpu.memory_space<vmem>>, vector<8x1xf32>,
    } else {
    }
    return
  }
  func.func @transform_0(%arg0: i32, %arg1: i32) -> (i32, i32) {
    %c0_i32 = arith.constant 0 : i32
    return %arg0, %arg1 : i32, i32
  }
  func.func @transform_1(%arg0: i32, %arg1: i32) -> (i32, i32) {
    %c0_i32 = arith.constant 0 : i32
    %c0_i32_0 = arith.constant 0 : i32
    return %arg0, %c0_i32 : i32, i32
  }
}

</mosaic_0001>

<bundles_post_ra>
// kernel: tpu_custom_call.1
= control target key start
LH: loop header
LB: loop body
LE: loop exit
PB: predicated region body
PF: predicated region fallthrough
CT: control target
= control target key end

     0   :  { %6 = vsyncpa [#allocation4], 0  ;;  %s89_s9 = smov [#allocation3]   ;;  %s106_s0 = inlined_call_operand.hbm [shape: f32[8,256], index: 0, kind: input, shape index: {}]   ;;  %s107_s1 = inlined_call_operand.vmem [shape: f32[8,1], index: 1, kind: output, shape index: {}]  }
   0x1   :  { %s12_s8 = sshll.u32 %s106_s0, 4  ;;  %s14_s10 = sshll.u32 %s89_s9, 4  ;;  %s13_s8 = int_to_ptr.hbm [resolvable:$true] %s12_s8  ;;  %s15_s10 = int_to_ptr.vmem [resolvable:$true] %s14_s10 }
   0x2   :  { %17 = dma.hbm_to_vmem [thread:$0]  %s13_s8, 256, %s15_s10, [#allocation4]  }
   0x3   :  { %87 = dma.done.wait [#allocation4], 256  }
   0x4   :  { %88 = vsyncadd [#allocation4], 4294967040  ;;  %v27_v0 = vld [vmem:[#allocation3] sm:$0xff]  ;;  %v28_v1 = vld [vmem:[#allocation3 + $0x8] sm:$0xff]  ;;  %vm53_vm1 = vcmask 7168  }
   0x5   :  { %v29_v2 = vmul.f32 %v27_v0, %v27_v0  ;;  %v30_v3 = vmul.f32 %v28_v1, %v28_v1 }
   0x7   :  { %v31_v4 = vadd.f32 %v30_v3, %v29_v2 }
   0x9   :  { %39 = vadd.xlane.f32.xlu0 %v31_v4 }
  0x7c   :  { %v40_v5 = vpop.xlane.xlu0 %39 }
  0x7d   :  { %61 = vrsqrt.f32 %v40_v5  ;;  %vm48_vm0 = vcmp.eq.f32.partialorder %v40_v5, inf  ;;  %v51_v13 = vand.u32 2147483648, %v40_v5  ;;  %vm50_vm2 = vcmp.eq.f32.partialorder %v40_v5, 0.0 }
  0x83   :  { %v62_v6 = vpop.eup %61 }
  0x84   :  { %v42_v7 = vmul.f32 %v62_v6, %v40_v5 }
  0x86   :  { %v43_v8 = vmul.f32 %v62_v6, %v42_v7 }
  0x88   :  { %v44_v9 = vmul.f32 0.5, %v43_v8 }
  0x8a   :  { %v45_v10 = vsub.f32 1.5, %v44_v9 }
  0x8c   :  { %v46_v11 = vmul.f32 %v62_v6, %v45_v10 }
  0x8e   :  { %v47_v12 = vmul.f32 %v46_v11, %v40_v5 }
  0x90   :  { %v49_v14 = vsel %vm48_vm0, %v40_v5, %v47_v12 }
  0x91   :  { %v52_v15 = vsel %vm50_vm2, %v51_v13, %v49_v14 }
  0x92   :  { %54 = vst.msk [vmem:[%s107_s1] sm:$0xff] %vm53_vm1, %v52_v15 }
  0x93   :  { %59 = vsyncpa [#allocation4], 1 }

</bundles_post_ra>
